<compile_context>
chip_gen: v7x
topology: tpu7x:2x2x1
jax: 0.10.0
libtpu: 0.0.40
codegen_flags: <defaults>
</compile_context>

<pallas_src>
import functools

import jax
import jax.numpy as jnp
import numpy as np
from jax.experimental import pallas as pl
from jax.experimental.pallas import tpu as pltpu

EPS = 1e-5  # nn.BatchNorm2d default eps


# ----------------------------------------------------------------------------
# Fused kernel: conv1 -> BN1 -> ReLU -> conv2 -> BN2 -> ReLU -> 2x2/2 maxpool
# ----------------------------------------------------------------------------
def _downsample_kernel(x_ref, t1_ref, t2_ref, s_ref, bn_ref, b_ref, r_ref, c_ref,
                       y_ref, p_ref, *, n, h, w, cin, cout):
    f32, bf16 = jnp.float32, jnp.bfloat16
    nh = n * h
    wc = w * cout
    q = nh // 4
    inv_cnt = 1.0 / float(n * h * w)

    bn = bn_ref[...]           # (4, wc) f32: [gamma1, beta1, gamma2, beta2], tiled across W
    b_bcast = b_ref[...]       # (wc, wc) f32: kron(ones(w,w), eye(cout))
    red_vec = jnp.full((8, nh), inv_cnt, f32)   # row-reduce matrix (mean weight folded in)

    def bn_relu(acc, g, beta):
        # Train-mode BatchNorm over (N, H, W) + ReLU. Both reductions ride the MXU:
        # red_vec collapses the n*h rows; b_bcast sums the W lane-groups per channel and
        # broadcasts the per-channel stat back to every lane. Two-pass (centered) variance.
        mu = jnp.dot(jnp.dot(red_vec, acc, preferred_element_type=f32),
                     b_bcast, preferred_element_type=f32)[0:1, :]
        centered = acc - mu
        var = jnp.dot(jnp.dot(red_vec, centered * centered, preferred_element_type=f32),
                      b_bcast, preferred_element_type=f32)[0:1, :]
        scale = g * jax.lax.rsqrt(var + EPS)
        return jnp.maximum(centered * scale + beta, 0.0)

    # ---- conv1: one K-stacked bf16 contraction (nh, 3*w*cin) @ (3*w*cin, wc) ----
    acc1 = jnp.dot(x_ref[...], t1_ref[...], preferred_element_type=f32)
    a1 = bn_relu(acc1, bn[0:1, :], bn[1:2, :])

    # ---- conv2: +/-1 row-shifted copies of a1 (image borders zeroed) via one 0/1
    #      shift-matrix matmul, then one K-stacked bf16 contraction (nh, 3*wc) @ (3*wc, wc)
    a1b = a1.astype(bf16)
    shifted = jnp.dot(s_ref[...], a1b, preferred_element_type=f32).astype(bf16)   # (2nh, wc)
    lhs2 = jnp.concatenate([shifted[0:nh], a1b, shifted[nh:2 * nh]], axis=1)      # (nh, 3wc)
    acc2 = jnp.dot(lhs2, t2_ref[...], preferred_element_type=f32)
    a2 = bn_relu(acc2, bn[2:3, :], bn[3:4, :])

    # ---- lane-dense store of the pre-pool activation (wc = 128 lanes, unmasked vst) ----
    y_ref[...] = a2

    # ---- fused 2x2 stride-2 maxpool, no lane-splitting reshapes ----
    # r_ref regroups rows into [4k, 4k+1, 4k+2, 4k+3]; elementwise max over the first two /
    # last two groups gives the H-pair max of two consecutive pooled rows; c_ref compacts
    # the even/odd W lane-groups so the final max is the W-pair max, already packed two
    # pooled rows per 128-lane output row. (f32 0/1 matmuls -> pooled values are exact
    # copies of y values.)
    sel = jnp.dot(r_ref[...], a2, preferred_element_type=f32)                     # (nh, wc)
    pair0 = jnp.maximum(sel[0:q, :], sel[q:2 * q, :])                             # (q, wc)
    pair1 = jnp.maximum(sel[2 * q:3 * q, :], sel[3 * q:4 * q, :])
    hcat = jnp.concatenate([pair0, pair1], axis=1)                                # (q, 2wc)
    tmp = jnp.dot(hcat, c_ref[...], preferred_element_type=f32)                   # (q, 2wc)
    p_ref[...] = jnp.maximum(tmp[:, 0:wc], tmp[:, wc:2 * wc])                     # (q, wc)


# ----------------------------------------------------------------------------
# Wrapper glue: layout transforms + constant matrices
# ----------------------------------------------------------------------------
def _toeplitz_conv_weights(w_oihw, width):
    """PyTorch (Cout, Cin, 3, 3) -> (3*width*Cin, width*Cout) stacked block-Toeplitz matrix
    T such that out_rows[h] = [in_rows[h-1] | in_rows[h] | in_rows[h+1]] @ T implements the
    3x3 conv with padding=1 (W padding encoded in T, H padding via the zeroed shifted rows)."""
    cout, cin, kh, kw = w_oihw.shape
    wk = jnp.transpose(w_oihw, (2, 3, 1, 0)).astype(jnp.float32)   # (ky, kx, cin, cout)
    mats = []
    for ky in range(kh):
        m = jnp.zeros((width * cin, width * cout), jnp.float32)
        for kx in range(kw):
            shift = jnp.eye(width, k=-(kx - 1), dtype=jnp.float32)  # w_in = w_out + kx - 1
            m = m + jnp.kron(shift, wk[ky, kx])
        mats.append(m)
    return jnp.concatenate(mats, axis=0)


def _shift_bn_pool_constants(n, h, w, cout):
    nh, wc, q = n * h, w * cout, (n * h) // 4
    # conv2 row shifts: rows 0..nh-1 -> a1 shifted down one row (zero at each image top),
    # rows nh..2nh-1 -> a1 shifted up one row (zero at each image bottom).
    s = np.zeros((2 * nh, nh), np.float32)
    for i in range(nh):
        if i % h != 0:
            s[i, i - 1] = 1.0
        if i % h != h - 1:
            s[nh + i, i + 1] = 1.0
    # BN cross-W per-channel sum + broadcast-back matrix.
    b = np.kron(np.ones((w, w), np.float32), np.eye(cout, dtype=np.float32))   # (wc, wc)
    # maxpool row regrouping: sel[j*q + k] = a2[4k + j]
    r = np.zeros((nh, nh), np.float32)
    for k in range(q):
        for j in range(4):
            r[j * q + k, 4 * k + j] = 1.0
    # maxpool W-pair selection/compaction producing the packed (q, wc) slab:
    # tmp[:, :wc] = even-W candidates, tmp[:, wc:] = odd-W candidates (max'ed in-kernel).
    c = np.zeros((2 * wc, 2 * wc), np.float32)
    for wp in range(w // 2):
        for ch in range(cout):
            lo, hi = wp * cout + ch, wc // 2 + wp * cout + ch
            even, odd = (2 * wp) * cout + ch, (2 * wp + 1) * cout + ch
            c[even, lo] = 1.0
            c[wc + even, hi] = 1.0
            c[odd, wc + lo] = 1.0
            c[wc + odd, wc + hi] = 1.0
    return s, b, r, c


def downsample_block(x_nchw, params):
    """Training-mode forward of Downsample_block; returns (pooled, y) like the PyTorch module.

    NOTE: conv biases are intentionally dropped -- a bias added immediately before a
    train-mode BatchNorm is removed exactly by the batch-mean subtraction. This wrapper
    therefore implements the module's default (training) forward only."""
    w1, b1, g1, bt1, w2, b2, g2, bt2 = params
    del b1, b2
    n, cin, h, w = x_nchw.shape
    cout = w1.shape[0]
    nh, wc = n * h, w * cout
    assert h % 2 == 0 and w % 2 == 0, "2x2/2 maxpool needs even spatial dims"
    assert wc == 128, "kernel is specialized to a 128-lane row panel (W*Cout == 128)"
    assert nh % 32 == 0, "row count must stay vreg-aligned through the pooling packing"

    f32, bf16 = jnp.float32, jnp.bfloat16

    # NCHW -> lane-dense row panel (N, H, W*Cin), H zero-padded, K-stacked for conv1.
    x_rp = jnp.transpose(x_nchw, (0, 2, 3, 1)).astype(f32).reshape(n, h, w * cin)
    x_pad = jnp.pad(x_rp, ((0, 0), (1, 1), (0, 0)))
    x_stk = jnp.concatenate([x_pad[:, 0:h], x_pad[:, 1:h + 1], x_pad[:, 2:h + 2]],
                            axis=-1).reshape(nh, 3 * w * cin).astype(bf16)

    t1 = _toeplitz_conv_weights(w1, w).astype(bf16)      # (3*w*cin, wc)
    t2 = _toeplitz_conv_weights(w2, w).astype(bf16)      # (3*wc,    wc)

    tile = lambda v: jnp.tile(v.astype(f32).reshape(1, cout), (1, w))
    bn = jnp.concatenate([tile(g1), tile(bt1), tile(g2), tile(bt2)], axis=0)   # (4, wc)

    s_np, b_np, r_np, c_np = _shift_bn_pool_constants(n, h, w, cout)
    s_mat = jnp.asarray(s_np, bf16)       # (2*nh, nh)  conv2 row shifts (0/1, bf16-exact)
    b_mat = jnp.asarray(b_np, f32)        # (wc, wc)    BN sum+broadcast
    r_mat = jnp.asarray(r_np, f32)        # (nh, nh)    pool row regroup
    c_mat = jnp.asarray(c_np, f32)        # (2wc, 2wc)  pool W compaction

    kernel = functools.partial(_downsample_kernel, n=n, h=h, w=w, cin=cin, cout=cout)
    vmem = pl.BlockSpec(memory_space=pltpu.MemorySpace.VMEM)

    flops = (2 * nh * (3 * w * cin) * wc                         # conv1
             + 2 * nh * (3 * wc) * wc                            # conv2
             + 2 * (2 * nh) * nh * wc                            # conv2 row shift
             + 2 * (2 * (2 * 8 * nh * wc) + 2 * (2 * 8 * wc * wc))   # BN stats (2 layers)
             + 2 * nh * nh * wc + 2 * (nh // 4) * (2 * wc) * (2 * wc))  # maxpool
    bytes_accessed = (2 * (x_stk.size + t1.size + t2.size + s_mat.size)
                      + 4 * (bn.size + b_mat.size + r_mat.size + c_mat.size)
                      + 4 * (nh * wc + (nh // 4) * wc))

    y2d, p2d = pl.pallas_call(
        kernel,
        out_shape=(jax.ShapeDtypeStruct((nh, wc), f32),
                   jax.ShapeDtypeStruct((nh // 4, wc), f32)),
        in_specs=[vmem] * 8,
        out_specs=(vmem, vmem),
        compiler_params=pltpu.CompilerParams(vmem_limit_bytes=32 * 1024 * 1024),
        cost_estimate=pl.CostEstimate(flops=flops, transcendentals=2 * wc,
                                      bytes_accessed=bytes_accessed),
    )(x_stk, t1, t2, s_mat, bn, b_mat, r_mat, c_mat)

    y = jnp.transpose(y2d.reshape(n, h, w, cout), (0, 3, 1, 2))
    # p2d rows hold two consecutive pooled rows packed into 128 lanes; a row-major flatten
    # restores the (n*h/2, (w/2)*cout) order exactly.
    pooled = jnp.transpose(p2d.reshape(n, h // 2, w // 2, cout), (0, 3, 1, 2))
    return pooled, y


# ----------------------------------------------------------------------------
# Pure-JAX f32 reference (identical semantics to the PyTorch module in train mode,
# INCLUDING the conv biases -- validates that dropping them in-kernel is exact).
# ----------------------------------------------------------------------------
def _reference(x, params):
    w1, b1, g1, bt1, w2, b2, g2, bt2 = params

    def conv(x, w, b):
        out = jax.lax.conv_general_dilated(
            x, w, window_strides=(1, 1), padding=((1, 1), (1, 1)),
            dimension_numbers=("NCHW", "OIHW", "NCHW"))
        return out + b[None, :, None, None]

    def bn_relu(x, g, bt):
        mu = jnp.mean(x, axis=(0, 2, 3), keepdims=True)
        var = jnp.mean((x - mu) ** 2, axis=(0, 2, 3), keepdims=True)
        return jnp.maximum(
            (x - mu) / jnp.sqrt(var + EPS) * g[None, :, None, None]
            + bt[None, :, None, None], 0.0)

    a = bn_relu(conv(x, w1, b1), g1, bt1)
    y = bn_relu(conv(a, w2, b2), g2, bt2)
    nb, c, hh, ww = y.shape
    p = jnp.max(y.reshape(nb, c, hh // 2, 2, ww // 2, 2), axis=(3, 5))
    return p, y


if __name__ == "__main__":
    key = jax.random.PRNGKey(0)
    N, Cin, Cout, H, W = 2, 4, 8, 16, 16

    ks = jax.random.split(key, 10)
    x = jax.random.normal(ks[0], (N, Cin, H, W), jnp.float32)
    w1 = 0.1 * jax.random.normal(ks[1], (Cout, Cin, 3, 3), jnp.float32)
    b1 = 0.1 * jax.random.normal(ks[2], (Cout,), jnp.float32)
    g1 = 1.0 + 0.1 * jax.random.normal(ks[3], (Cout,), jnp.float32)
    bt1 = 0.1 * jax.random.normal(ks[4], (Cout,), jnp.float32)
    w2 = 0.1 * jax.random.normal(ks[5], (Cout, Cout, 3, 3), jnp.float32)
    b2 = 0.1 * jax.random.normal(ks[6], (Cout,), jnp.float32)
    g2 = 1.0 + 0.1 * jax.random.normal(ks[7], (Cout,), jnp.float32)
    bt2 = 0.1 * jax.random.normal(ks[8], (Cout,), jnp.float32)

    params = (w1, b1, g1, bt1, w2, b2, g2, bt2)

    pooled, y = downsample_block(x, params)
    jax.block_until_ready((pooled, y))

    # Sanity check against the pure-f32 reference. Tolerance is relaxed vs. the previous
    # f32 kernel because the conv MXU operands are now bf16 (f32 accumulation); observed
    # error is well inside 2e-2.
    p_ref, y_ref = _reference(x, params)
    assert pooled.shape == (N, Cout, H // 2, W // 2) and y.shape == (N, Cout, H, W)
    np.testing.assert_allclose(np.asarray(y), np.asarray(y_ref), rtol=2e-2, atol=2e-2)
    np.testing.assert_allclose(np.asarray(pooled), np.asarray(p_ref), rtol=2e-2, atol=2e-2)

    print("KERNEL_OK")
</pallas_src>

<mosaic_0001>
module attributes {stable_mosaic.version = 11 : i64} {
  func.func @_downsample_kernel(%arg0: memref<32x192xbf16, #tpu.memory_space<vmem>>, %arg1: memref<192x128xbf16, #tpu.memory_space<vmem>>, %arg2: memref<384x128xbf16, #tpu.memory_space<vmem>>, %arg3: memref<64x32xbf16, #tpu.memory_space<vmem>>, %arg4: memref<4x128xf32, #tpu.memory_space<vmem>>, %arg5: memref<128x128xf32, #tpu.memory_space<vmem>>, %arg6: memref<32x32xf32, #tpu.memory_space<vmem>>, %arg7: memref<256x256xf32, #tpu.memory_space<vmem>>, %arg8: memref<32x128xf32, #tpu.memory_space<vmem>>, %arg9: memref<8x128xf32, #tpu.memory_space<vmem>>) attributes {dimension_semantics = [], scalar_prefetch = 0 : i64, scratch_operands = 0 : i64, tpu.core_type = #tpu.core_type<tc>} {
    %c0 = arith.constant 0 : index
    %c0_0 = arith.constant 0 : index
    %0 = vector.load %arg4[%c0, %c0_0] : memref<4x128xf32, #tpu.memory_space<vmem>>, vector<4x128xf32>
    %c0_1 = arith.constant 0 : index
    %c0_2 = arith.constant 0 : index
    %1 = vector.load %arg5[%c0_1, %c0_2] : memref<128x128xf32, #tpu.memory_space<vmem>>, vector<128x128xf32>
    %cst = arith.constant 0.001953125 : f32
    %2 = vector.broadcast %cst : f32 to vector<8x32xf32>
    %c0_3 = arith.constant 0 : index
    %c0_4 = arith.constant 0 : index
    %3 = vector.load %arg0[%c0_3, %c0_4] : memref<32x192xbf16, #tpu.memory_space<vmem>>, vector<32x192xbf16>
    %c0_5 = arith.constant 0 : index
    %c0_6 = arith.constant 0 : index
    %4 = vector.load %arg1[%c0_5, %c0_6] : memref<192x128xbf16, #tpu.memory_space<vmem>>, vector<192x128xbf16>
    %cst_7 = arith.constant dense<0.000000e+00> : vector<32x128xf32>
    %5 = tpu.matmul %3, %4, %cst_7 {dimension_numbers = #tpu.dot_dimension_numbers<[1], [0], [0], [1], [0, 0, 1, 1], [], []>} : vector<32x192xbf16>, vector<192x128xbf16>, vector<32x128xf32> -> vector<32x128xf32>
    %6 = vector.extract_strided_slice %0 {offsets = [0, 0], sizes = [1, 128], strides = [1, 1]} : vector<4x128xf32> to vector<1x128xf32>
    %7 = vector.extract_strided_slice %0 {offsets = [1, 0], sizes = [1, 128], strides = [1, 1]} : vector<4x128xf32> to vector<1x128xf32>
    %cst_8 = arith.constant dense<0.000000e+00> : vector<8x128xf32>
    %8 = tpu.matmul %2, %5, %cst_8 {dimension_numbers = #tpu.dot_dimension_numbers<[1], [0], [0], [1], [0, 0, 1, 1], [], []>} : vector<8x32xf32>, vector<32x128xf32>, vector<8x128xf32> -> vector<8x128xf32>
    %cst_9 = arith.constant dense<0.000000e+00> : vector<8x128xf32>
    %9 = tpu.matmul %8, %1, %cst_9 {dimension_numbers = #tpu.dot_dimension_numbers<[1], [0], [0], [1], [0, 0, 1, 1], [], []>} : vector<8x128xf32>, vector<128x128xf32>, vector<8x128xf32> -> vector<8x128xf32>
    %10 = vector.extract_strided_slice %9 {offsets = [0, 0], sizes = [1, 128], strides = [1, 1]} : vector<8x128xf32> to vector<1x128xf32>
    %11 = vector.broadcast %10 : vector<1x128xf32> to vector<32x128xf32>
    %12 = arith.subf %5, %11 : vector<32x128xf32>
    %13 = arith.mulf %12, %12 : vector<32x128xf32>
    %cst_10 = arith.constant dense<0.000000e+00> : vector<8x128xf32>
    %14 = tpu.matmul %2, %13, %cst_10 {dimension_numbers = #tpu.dot_dimension_numbers<[1], [0], [0], [1], [0, 0, 1, 1], [], []>} : vector<8x32xf32>, vector<32x128xf32>, vector<8x128xf32> -> vector<8x128xf32>
    %cst_11 = arith.constant dense<0.000000e+00> : vector<8x128xf32>
    %15 = tpu.matmul %14, %1, %cst_11 {dimension_numbers = #tpu.dot_dimension_numbers<[1], [0], [0], [1], [0, 0, 1, 1], [], []>} : vector<8x128xf32>, vector<128x128xf32>, vector<8x128xf32> -> vector<8x128xf32>
    %16 = vector.extract_strided_slice %15 {offsets = [0, 0], sizes = [1, 128], strides = [1, 1]} : vector<8x128xf32> to vector<1x128xf32>
    %cst_12 = arith.constant 9.99999974E-6 : f32
    %17 = vector.broadcast %cst_12 : f32 to vector<1x128xf32>
    %18 = arith.addf %16, %17 : vector<1x128xf32>
    %19 = math.rsqrt %18 : vector<1x128xf32>
    %20 = arith.mulf %6, %19 : vector<1x128xf32>
    %21 = vector.broadcast %20 : vector<1x128xf32> to vector<32x128xf32>
    %22 = arith.mulf %12, %21 : vector<32x128xf32>
    %23 = vector.broadcast %7 : vector<1x128xf32> to vector<32x128xf32>
    %24 = arith.addf %22, %23 : vector<32x128xf32>
    %cst_13 = arith.constant 0.000000e+00 : f32
    %25 = vector.broadcast %cst_13 : f32 to vector<32x128xf32>
    %26 = arith.maximumf %24, %25 : vector<32x128xf32>
    %27 = arith.truncf %26 : vector<32x128xf32> to vector<32x128xbf16>
    %c0_14 = arith.constant 0 : index
    %c0_15 = arith.constant 0 : index
    %28 = vector.load %arg3[%c0_14, %c0_15] : memref<64x32xbf16, #tpu.memory_space<vmem>>, vector<64x32xbf16>
    %cst_16 = arith.constant dense<0.000000e+00> : vector<64x128xf32>
    %29 = tpu.matmul %28, %27, %cst_16 {dimension_numbers = #tpu.dot_dimension_numbers<[1], [0], [0], [1], [0, 0, 1, 1], [], []>} : vector<64x32xbf16>, vector<32x128xbf16>, vector<64x128xf32> -> vector<64x128xf32>
    %30 = arith.truncf %29 : vector<64x128xf32> to vector<64x128xbf16>
    %31 = vector.extract_strided_slice %30 {offsets = [0, 0], sizes = [32, 128], strides = [1, 1]} : vector<64x128xbf16> to vector<32x128xbf16>
    %32 = vector.extract_strided_slice %30 {offsets = [32, 0], sizes = [32, 128], strides = [1, 1]} : vector<64x128xbf16> to vector<32x128xbf16>
    %33 = tpu.concatenate %31, %27, %32 in 1 : vector<32x128xbf16>, vector<32x128xbf16>, vector<32x128xbf16> -> vector<32x384xbf16>
    %c0_17 = arith.constant 0 : index
    %c0_18 = arith.constant 0 : index
    %34 = vector.load %arg2[%c0_17, %c0_18] : memref<384x128xbf16, #tpu.memory_space<vmem>>, vector<384x128xbf16>
    %cst_19 = arith.constant dense<0.000000e+00> : vector<32x128xf32>
    %35 = tpu.matmul %33, %34, %cst_19 {dimension_numbers = #tpu.dot_dimension_numbers<[1], [0], [0], [1], [0, 0, 1, 1], [], []>} : vector<32x384xbf16>, vector<384x128xbf16>, vector<32x128xf32> -> vector<32x128xf32>
    %36 = vector.extract_strided_slice %0 {offsets = [2, 0], sizes = [1, 128], strides = [1, 1]} : vector<4x128xf32> to vector<1x128xf32>
    %37 = vector.extract_strided_slice %0 {offsets = [3, 0], sizes = [1, 128], strides = [1, 1]} : vector<4x128xf32> to vector<1x128xf32>
    %cst_20 = arith.constant dense<0.000000e+00> : vector<8x128xf32>
    %38 = tpu.matmul %2, %35, %cst_20 {dimension_numbers = #tpu.dot_dimension_numbers<[1], [0], [0], [1], [0, 0, 1, 1], [], []>} : vector<8x32xf32>, vector<32x128xf32>, vector<8x128xf32> -> vector<8x128xf32>
    %cst_21 = arith.constant dense<0.000000e+00> : vector<8x128xf32>
    %39 = tpu.matmul %38, %1, %cst_21 {dimension_numbers = #tpu.dot_dimension_numbers<[1], [0], [0], [1], [0, 0, 1, 1], [], []>} : vector<8x128xf32>, vector<128x128xf32>, vector<8x128xf32> -> vector<8x128xf32>
    %40 = vector.extract_strided_slice %39 {offsets = [0, 0], sizes = [1, 128], strides = [1, 1]} : vector<8x128xf32> to vector<1x128xf32>
    %41 = vector.broadcast %40 : vector<1x128xf32> to vector<32x128xf32>
    %42 = arith.subf %35, %41 : vector<32x128xf32>
    %43 = arith.mulf %42, %42 : vector<32x128xf32>
    %cst_22 = arith.constant dense<0.000000e+00> : vector<8x128xf32>
    %44 = tpu.matmul %2, %43, %cst_22 {dimension_numbers = #tpu.dot_dimension_numbers<[1], [0], [0], [1], [0, 0, 1, 1], [], []>} : vector<8x32xf32>, vector<32x128xf32>, vector<8x128xf32> -> vector<8x128xf32>
    %cst_23 = arith.constant dense<0.000000e+00> : vector<8x128xf32>
    %45 = tpu.matmul %44, %1, %cst_23 {dimension_numbers = #tpu.dot_dimension_numbers<[1], [0], [0], [1], [0, 0, 1, 1], [], []>} : vector<8x128xf32>, vector<128x128xf32>, vector<8x128xf32> -> vector<8x128xf32>
    %46 = vector.extract_strided_slice %45 {offsets = [0, 0], sizes = [1, 128], strides = [1, 1]} : vector<8x128xf32> to vector<1x128xf32>
    %cst_24 = arith.constant 9.99999974E-6 : f32
    %47 = vector.broadcast %cst_24 : f32 to vector<1x128xf32>
    %48 = arith.addf %46, %47 : vector<1x128xf32>
    %49 = math.rsqrt %48 : vector<1x128xf32>
    %50 = arith.mulf %36, %49 : vector<1x128xf32>
    %51 = vector.broadcast %50 : vector<1x128xf32> to vector<32x128xf32>
    %52 = arith.mulf %42, %51 : vector<32x128xf32>
    %53 = vector.broadcast %37 : vector<1x128xf32> to vector<32x128xf32>
    %54 = arith.addf %52, %53 : vector<32x128xf32>
    %cst_25 = arith.constant 0.000000e+00 : f32
    %55 = vector.broadcast %cst_25 : f32 to vector<32x128xf32>
    %56 = arith.maximumf %54, %55 : vector<32x128xf32>
    %c0_26 = arith.constant 0 : index
    %c0_27 = arith.constant 0 : index
    %57 = vector.load %arg8[%c0_26, %c0_27] : memref<32x128xf32, #tpu.memory_space<vmem>>, vector<32x128xf32>
    tpu.vector_store %arg8[%c0_26, %c0_27], %56 {strides = array<i32>} : memref<32x128xf32, #tpu.memory_space<vmem>>, vector<32x128xf32>,
    %c0_28 = arith.constant 0 : index
    %c0_29 = arith.constant 0 : index
    %58 = vector.load %arg6[%c0_28, %c0_29] : memref<32x32xf32, #tpu.memory_space<vmem>>, vector<32x32xf32>
    %cst_30 = arith.constant dense<0.000000e+00> : vector<32x128xf32>
    %59 = tpu.matmul %58, %56, %cst_30 {dimension_numbers = #tpu.dot_dimension_numbers<[1], [0], [0], [1], [0, 0, 1, 1], [], []>} : vector<32x32xf32>, vector<32x128xf32>, vector<32x128xf32> -> vector<32x128xf32>
    %60 = vector.extract_strided_slice %59 {offsets = [0, 0], sizes = [8, 128], strides = [1, 1]} : vector<32x128xf32> to vector<8x128xf32>
    %61 = vector.extract_strided_slice %59 {offsets = [8, 0], sizes = [8, 128], strides = [1, 1]} : vector<32x128xf32> to vector<8x128xf32>
    %62 = arith.maximumf %60, %61 : vector<8x128xf32>
    %63 = vector.extract_strided_slice %59 {offsets = [16, 0], sizes = [8, 128], strides = [1, 1]} : vector<32x128xf32> to vector<8x128xf32>
    %64 = vector.extract_strided_slice %59 {offsets = [24, 0], sizes = [8, 128], strides = [1, 1]} : vector<32x128xf32> to vector<8x128xf32>
    %65 = arith.maximumf %63, %64 : vector<8x128xf32>
    %66 = tpu.concatenate %62, %65 in 1 : vector<8x128xf32>, vector<8x128xf32> -> vector<8x256xf32>
    %c0_31 = arith.constant 0 : index
    %c0_32 = arith.constant 0 : index
    %67 = vector.load %arg7[%c0_31, %c0_32] : memref<256x256xf32, #tpu.memory_space<vmem>>, vector<256x256xf32>
    %cst_33 = arith.constant dense<0.000000e+00> : vector<8x256xf32>
    %68 = tpu.matmul %66, %67, %cst_33 {dimension_numbers = #tpu.dot_dimension_numbers<[1], [0], [0], [1], [0, 0, 1, 1], [], []>} : vector<8x256xf32>, vector<256x256xf32>, vector<8x256xf32> -> vector<8x256xf32>
    %69 = vector.extract_strided_slice %68 {offsets = [0, 0], sizes = [8, 128], strides = [1, 1]} : vector<8x256xf32> to vector<8x128xf32>
    %70 = vector.extract_strided_slice %68 {offsets = [0, 128], sizes = [8, 128], strides = [1, 1]} : vector<8x256xf32> to vector<8x128xf32>
    %71 = arith.maximumf %69, %70 : vector<8x128xf32>
    %c0_34 = arith.constant 0 : index
    %c0_35 = arith.constant 0 : index
    %72 = vector.load %arg9[%c0_34, %c0_35] : memref<8x128xf32, #tpu.memory_space<vmem>>, vector<8x128xf32>
    tpu.vector_store %arg9[%c0_34, %c0_35], %71 {strides = array<i32>} : memref<8x128xf32, #tpu.memory_space<vmem>>, vector<8x128xf32>,
    return
  }
}

</mosaic_0001>

<bundles_post_ra>
// kernel: tpu_custom_call.1
= control target key start
LH: loop header
LB: loop body
LE: loop exit
PB: predicated region body
PF: predicated region fallthrough
CT: control target
= control target key end

     0   :  { %15 = vsyncpa [#allocation3], 0  ;;  %s2804_s0 = inlined_call_operand.vmem [shape: bf16[32,192], index: 0, kind: input, shape index: {}]   ;;  %s2805_s1 = inlined_call_operand.hbm [shape: bf16[192,128], index: 1, kind: input, shape index: {}]   ;;  %s2806_s2 = inlined_call_operand.hbm [shape: bf16[384,128], index: 2, kind: input, shape index: {}]   ;;  %s2807_s3 = inlined_call_operand.vmem [shape: bf16[64,32], index: 3, kind: input, shape index: {}]   ;;  %s2808_s4 = inlined_call_operand.hbm [shape: f32[4,128], index: 4, kind: input, shape index: {}]   ;;  %s2809_s5 = inlined_call_operand.hbm [shape: f32[128,128], index: 5, kind: input, shape index: {}]   ;;  %s2810_s6 = inlined_call_operand.vmem [shape: f32[32,32], index: 6, kind: input, shape index: {}]   ;;  %s2811_s7 = inlined_call_operand.hbm [shape: f32[256,256], index: 7, kind: input, shape index: {}]   ;;  %s2812_s8 = inlined_call_operand.hbm [shape: f32[32,128], index: 8, kind: output, shape index: {0}]   ;;  %s2813_s9 = inlined_call_operand.hbm [shape: f32[8,128], index: 9, kind: output, shape index: {1}]  }
   0x1   :  { %16 = vsyncpa [#allocation6], 0 }
   0x2   :  { %17 = vsyncpa [#allocation9], 0 }
   0x3   :  { %18 = vsyncpa [#allocation4], 0 }
   0x4   :  { %19 = vsyncpa [#allocation13], 0  ;;  %s2458_s30 = smov [#allocation5]   ;;  %s2459_s11 = smov [#allocation8]  }
   0x5   :  { %s39_s10 = sshll.u32 %s2458_s30, 4  ;;  %s63_s12 = sshll.u32 %s2459_s11, 4  ;;  %s40_s10 = int_to_ptr.vmem [resolvable:$true] %s39_s10  ;;  %s2526_s12 = int_to_ptr.vmem [resolvable:$true] %s63_s12 }
   0x6   :  { %s2294_s15 = scalar_lea.hbm %s2806_s2, 3072 }
   0x7   :  { %p2295_p0 = scmp.ne.s32.totalorder %s2806_s2, %s2294_s15  ;;  %p2298_p1 = scmp.lt.u32.totalorder %s2294_s15, %s2806_s2 }
   0x9   :  { %p2300_p2 = pnand %p2298_p1, %p2295_p0 }
   0xb   :  { %2303 = shalt.err (!%p2300_p2)
}
   0xc   :  { %s2304_s20 = scalar_lea.vmem %s40_s10, 3072  ;;  %p2309_p4 = scmp.lt.s32.totalorder %s40_s10, %s40_s10 }
   0xd   :  { %p2305_p3 = scmp.ne.s32.totalorder %s40_s10, %s2304_s20  ;;  %p2310_p5 = scmp.lt.s32.totalorder %s2304_s20, %s2304_s20 }
   0xf   :  { %p2311_p6 = por %p2310_p5, %p2309_p4 }
  0x11   :  { %p2312_p7 = pnand %p2311_p6, %p2305_p3 }
  0x13   :  { %2315 = shalt.err (!%p2312_p7)
}
  0x14   :  { %s2460_s21 = smov 64   ;;  %s2461_s22 = smov 4  }
  0x15   :  { %45 = dma.hbm_to_vmem [thread:$0]  %s2806_s2, 3072, %s40_s10, [#allocation6], %s2460_s21, %s2460_s21, %s2461_s22  }
  0x16   :  { %s2316_s27 = scalar_lea.hbm %s2809_s5, 2048 }
  0x17   :  { %p2317_p8 = scmp.ne.s32.totalorder %s2809_s5, %s2316_s27  ;;  %p2320_p9 = scmp.lt.u32.totalorder %s2316_s27, %s2809_s5 }
  0x19   :  { %p2322_p10 = pnand %p2320_p9, %p2317_p8 }
  0x1b   :  { %2325 = shalt.err (!%p2322_p10)
}
  0x1c   :  { %s2326_s13 = scalar_lea.vmem %s2526_s12, 2048  ;;  %p2331_p12 = scmp.lt.s32.totalorder %s2526_s12, %s2526_s12 }
  0x1d   :  { %p2327_p11 = scmp.ne.s32.totalorder %s2526_s12, %s2326_s13  ;;  %p2332_p13 = scmp.lt.s32.totalorder %s2326_s13, %s2326_s13 }
  0x1f   :  { %p2333_p0 = por %p2332_p13, %p2331_p12 }
  0x21   :  { %p2334_p1 = pnand %p2333_p0, %p2327_p11 }
  0x23   :  { %2337 = shalt.err (!%p2334_p1)
}
  0x24   :  { %s2462_s2 = smov 128   ;;  %s2463_s10 = smov 8  }
  0x25   :  { %69 = dma.hbm_to_vmem [thread:$0]  %s2809_s5, 2048, %s2526_s12, [#allocation9], %s2462_s2, %s2462_s2, %s2463_s10  }
  0x26   :  { %s2464_s16 = smov [#allocation2]   ;;  %s2465_s18 = smov [#allocation7]  }
  0x27   :  { %s27_s17 = sshll.u32 %s2464_s16, 4  ;;  %s54_s19 = sshll.u32 %s2465_s18, 4  ;;  %s28_s17 = int_to_ptr.vmem [resolvable:$true] %s27_s17  ;;  %s55_s19 = int_to_ptr.vmem [resolvable:$true] %s54_s19 }
  0x28   :  { %s2338_s24 = scalar_lea.hbm %s2805_s1, 1536 }
  0x29   :  { %p2339_p2 = scmp.ne.s32.totalorder %s2805_s1, %s2338_s24  ;;  %p2342_p3 = scmp.lt.u32.totalorder %s2338_s24, %s2805_s1 }
  0x2b   :  { %p2344_p4 = pnand %p2342_p3, %p2339_p2 }
  0x2d   :  { %2347 = shalt.err (!%p2344_p4)
}
  0x2e   :  { %s2348_s5 = scalar_lea.vmem %s28_s17, 1536  ;;  %p2353_p6 = scmp.lt.s32.totalorder %s28_s17, %s28_s17 }
  0x2f   :  { %p2349_p5 = scmp.ne.s32.totalorder %s28_s17, %s2348_s5  ;;  %p2354_p7 = scmp.lt.s32.totalorder %s2348_s5, %s2348_s5 }
  0x31   :  { %p2355_p8 = por %p2354_p7, %p2353_p6 }
  0x33   :  { %p2356_p9 = pnand %p2355_p8, %p2349_p5 }
  0x35   :  { %2359 = shalt.err (!%p2356_p9)
}
  0x36   :  { %33 = dma.hbm_to_vmem [thread:$0]  %s2805_s1, 1536, %s28_s17, [#allocation3], %s2460_s21, %s2460_s21, %s2461_s22  }
  0x37   :  { %s2360_s13 = scalar_lea.hbm %s2808_s4, 64 }
  0x38   :  { %p2361_p10 = scmp.ne.s32.totalorder %s2808_s4, %s2360_s13  ;;  %p2364_p11 = scmp.lt.u32.totalorder %s2360_s13, %s2808_s4 }
  0x3a   :  { %p2366_p12 = pnand %p2364_p11, %p2361_p10 }
  0x3c   :  { %2369 = shalt.err (!%p2366_p12)
}
  0x3d   :  { %s2370_s20 = scalar_lea.vmem %s55_s19, 64  ;;  %p2375_p0 = scmp.lt.s32.totalorder %s55_s19, %s55_s19 }
  0x3e   :  { %p2371_p13 = scmp.ne.s32.totalorder %s55_s19, %s2370_s20  ;;  %p2376_p1 = scmp.lt.s32.totalorder %s2370_s20, %s2370_s20 }
  0x40   :  { %p2377_p2 = por %p2376_p1, %p2375_p0 }
  0x42   :  { %p2378_p3 = pnand %p2377_p2, %p2371_p13 }
  0x44   :  { %2381 = shalt.err (!%p2378_p3)
}
  0x45   :  { %57 = dma.hbm_to_vmem [thread:$0]  %s2808_s4, 64, %s55_s19, [#allocation6]  }
  0x46   :  { %s2466_s22 = smov [#allocation10]   ;;  %s2382_s25 = scalar_lea.hbm %s2811_s7, 8192 }
  0x47   :  { %s77_s17 = sshll.u32 %s2466_s22, 4  ;;  %p2383_p4 = scmp.ne.s32.totalorder %s2811_s7, %s2382_s25  ;;  %s78_s17 = int_to_ptr.vmem [resolvable:$true] %s77_s17 }
  0x48   :  { %p2386_p5 = scmp.lt.u32.totalorder %s2382_s25, %s2811_s7 }
  0x4a   :  { %p2388_p6 = pnand %p2386_p5, %p2383_p4 }
  0x4c   :  { %2391 = shalt.err (!%p2388_p6)
}
  0x4d   :  { %s2392_s12 = scalar_lea.vmem %s78_s17, 8192  ;;  %p2397_p8 = scmp.lt.s32.totalorder %s78_s17, %s78_s17 }
  0x4e   :  { %p2393_p7 = scmp.ne.s32.totalorder %s78_s17, %s2392_s12  ;;  %p2398_p9 = scmp.lt.s32.totalorder %s2392_s12, %s2392_s12 }
  0x50   :  { %p2399_p10 = por %p2398_p9, %p2397_p8 }
  0x52   :  { %p2400_p11 = pnand %p2399_p10, %p2393_p7 }
  0x54   :  { %2403 = shalt.err (!%p2400_p11)
}
  0x55   :  { %s2467_s4 = smov 256   ;;  %s2468_s19 = smov 16  }
  0x56   :  { %83 = dma.hbm_to_vmem [thread:$0]  %s2811_s7, 8192, %s78_s17, [#allocation9], %s2467_s4, %s2467_s4, %s2468_s19  }
  0x57   :  { %2448 = dma.done.wait [#allocation3], 1536  }
  0x58   :  { %2449 = vsyncadd [#allocation3], 4294965760 }
  0x59   :  { %2450 = dma.done.wait [#allocation6], 3136  }
  0x5a   :  { %2451 = vsyncadd [#allocation6], 4294964160 }
  0x5b   :  { %2452 = dma.done.wait [#allocation9], 10240  }
  0x5c   :  { %2453 = vsyncadd [#allocation9], 4294957056  ;;  %v2469_v0 = vmov 0   ;;  %v2244_v1 = vld [vmem:[#allocation2] sm:$0xff]   ;;  %v2245_v2 = vld [vmem:[#allocation2 + $0x8] sm:$0xff]   ;;  %vm235_vm0 = vcmask 523264   ;;  %v435_v56 = vlaneseq }
  0x5d   :  { %242 = vmatprep.subr.bf16.mxu0 %v2469_v0  ;;  %v2246_v3 = vld [vmem:[#allocation2 + $0x10] sm:$0xff]   ;;  %v2247_v4 = vld [vmem:[#allocation2 + $0x18] sm:$0xff]   ;;  %v2258_v5 = vld [vmem:[%s2804_s0 + $0x4] ss:$8 sps:$4 sm:$0xff]   ;;  %v2470_v17 = vmov 0.0|0.0   ;;  %vm2471_vm1 = vmmov 0  }
  0x5e   :  { %243 = vmatpush1.bf16.msra.mxu0 %v2244_v1  ;;  %v2248_v6 = vld [vmem:[#allocation2 + $0x20] sm:$0xff]   ;;  %1622 = vmatprep.mubr.msk.bf16.mxu0 %vm235_vm0, %v2258_v5  ;;  %v2249_v7 = vld [vmem:[#allocation2 + $0x28] sm:$0xff]   ;;  %v2250_v8 = vld [vmem:[#allocation2 + $0x30] sm:$0xff]   ;;  %v2472_v18 = vmov 0.0   ;;  %vm291_vm2 = vcmask 261120   ;;  %v2473_v53 = vmov 0.001953125  }
  0x5f   :  { %244 = vmatprep.subr.bf16.mxu0 %v2469_v0  ;;  %v2251_v9 = vld [vmem:[#allocation2 + $0x38] sm:$0xff]   ;;  %v2252_v10 = vld [vmem:[#allocation2 + $0x40] sm:$0xff]   ;;  %v2253_v11 = vld [vmem:[#allocation2 + $0x48] sm:$0xff]   ;;  %2034 = vmatprep.subr.bf16.mxu1 %v2470_v17  ;;  %v2677_v57 = vshrl.u32 %v435_v56, 7 }
  0x60   :  { %v2254_v12 = vld [vmem:[#allocation2 + $0x50] sm:$0xff]   ;;  %v2255_v13 = vld [vmem:[#allocation2 + $0x58] sm:$0xff]   ;;  %v2256_v14 = vld [vmem:[%s2804_s0] ss:$8 sps:$4 sm:$0xff]   ;;  %1812 = vmatprep.mubr.msk.f32.mxu1 %vm2471_vm1, %v2472_v18 }
  0x61   :  { %v2259_v15 = vld [vmem:[%s2804_s0 + $0x14] ss:$8 sps:$4 sm:$0xff]   ;;  %v2261_v16 = vld [vmem:[%s2804_s0 + $0x10] ss:$8 sps:$4 sm:$0xff]   ;;  %v101_v19 = vld [vmem:[#allocation8] sm:$0xff]  ;;  %v2680_v58 = vsub.s32 0, %v2677_v57 }
  0x62   :  { %245 = vmatpush1.bf16.msra.mxu0 %v2245_v2  ;;  %v102_v20 = vld [vmem:[#allocation8 + $0x8] sm:$0xff]  ;;  %v103_v21 = vld [vmem:[#allocation8 + $0x10] sm:$0xff]  ;;  %v104_v23 = vld [vmem:[#allocation8 + $0x18] sm:$0xff] }
  0x63   :  { %246 = vmatprep.subr.bf16.mxu0 %v2469_v0  ;;  %v2622_v22 = vpack.c.bf16 %v102_v20, %v101_v19  ;;  %v2625_v24 = vpack.c.bf16 %v104_v23, %v103_v21  ;;  %v105_v25 = vld [vmem:[#allocation8 + $0x20] sm:$0xff]  ;;  %v106_v26 = vld [vmem:[#allocation8 + $0x28] sm:$0xff]  ;;  %v107_v28 = vld [vmem:[#allocation8 + $0x30] sm:$0xff]  ;;  %v600_v23 = vsub.s32 1, %v2677_v57 }
  0x64   :  { %v2629_v27 = vpack.c.bf16 %v106_v26, %v105_v25  ;;  %v108_v29 = vld [vmem:[#allocation8 + $0x38] sm:$0xff]  ;;  %v109_v31 = vld [vmem:[#allocation8 + $0x40] sm:$0xff]  ;;  %v110_v32 = vld [vmem:[#allocation8 + $0x48] sm:$0xff] }
  0x65   :  { %v2633_v30 = vpack.c.bf16 %v108_v29, %v107_v28  ;;  %v2637_v33 = vpack.c.bf16 %v110_v32, %v109_v31  ;;  %v111_v34 = vld [vmem:[#allocation8 + $0x50] sm:$0xff]  ;;  %v112_v35 = vld [vmem:[#allocation8 + $0x58] sm:$0xff]  ;;  %v113_v37 = vld [vmem:[#allocation8 + $0x60] sm:$0xff] }
  0x66   :  { %247 = vmatpush1.bf16.msra.mxu0 %v2246_v3  ;;  %v2641_v36 = vpack.c.bf16 %v112_v35, %v111_v34  ;;  %v114_v38 = vld [vmem:[#allocation8 + $0x68] sm:$0xff]  ;;  %v115_v40 = vld [vmem:[#allocation8 + $0x70] sm:$0xff]  ;;  %v116_v41 = vld [vmem:[#allocation8 + $0x78] sm:$0xff] }
  0x67   :  { %248 = vmatprep.subr.bf16.mxu0 %v2469_v0  ;;  %v2645_v39 = vpack.c.bf16 %v114_v38, %v113_v37  ;;  %v2649_v42 = vpack.c.bf16 %v116_v41, %v115_v40  ;;  %v2690_v21 = vld [vmem:[#allocation7] sm:$0xf]  ;;  %v2270_v56 = vld [vmem:[#allocation5 + $0x50] sm:$0xff]  }
  0x68   :  { %v601_v29 = vrot.slane %v2690_v21, %v600_v23 }
  0x6a   :  { %249 = vmatpush1.bf16.msra.mxu0 %v2247_v4 }
  0x6b   :  { %250 = vmatprep.subr.bf16.mxu0 %v2469_v0 }
  0x6e   :  { %251 = vmatpush1.bf16.msra.mxu0 %v2248_v6 }
  0x6f   :  { %252 = vmatprep.subr.bf16.mxu0 %v2469_v0 }
  0x72   :  { %253 = vmatpush1.bf16.msra.mxu0 %v2249_v7 }
  0x73   :  { %254 = vmatprep.subr.bf16.mxu0 %v2469_v0 }
  0x76   :  { %255 = vmatpush1.bf16.msra.mxu0 %v2250_v8 }
  0x77   :  { %256 = vmatprep.subr.bf16.mxu0 %v2469_v0 }
  0x7a   :  { %257 = vmatpush1.bf16.msra.mxu0 %v2251_v9 }
  0x7b   :  { %258 = vmatprep.subr.bf16.mxu0 %v2469_v0 }
  0x7e   :  { %259 = vmatpush1.bf16.msra.mxu0 %v2252_v10  ;;  %v2262_v10 = vld [vmem:[%s2807_s3] sm:$0xff]  }
  0x7f   :  { %260 = vmatprep.subr.bf16.mxu0 %v2469_v0 }
  0x82   :  { %261 = vmatpush1.bf16.msra.mxu0 %v2253_v11  ;;  %v2272_v11 = vld [vmem:[#allocation5 + $0x80] sm:$0xff]  }
  0x83   :  { %262 = vmatprep.subr.bf16.mxu0 %v2469_v0 }
  0x86   :  { %263 = vmatpush1.bf16.msra.mxu0 %v2254_v12  ;;  %v2275_v12 = vld [vmem:[#allocation5 + $0x88] sm:$0xff]  }
  0x87   :  { %264 = vmatprep.subr.bf16.mxu0 %v2469_v0 }
  0x8a   :  { %265 = vmatpush1.bf16.msra.mxu0 %v2255_v13  ;;  %v2278_v13 = vld [vmem:[#allocation5 + $0x90] sm:$0xff]  }
  0x8b   :  { %2040 = vmatprep.subr.bf16.mxu0 %v2470_v17 }
  0x8d   :  { %275 = vmatmul.mubr.bf16.vlgmr.msra.gmra.mrb[0].mxu0 %v2256_v14  ;;  %v2281_v14 = vld [vmem:[#allocation5 + $0x98] sm:$0xff]  }
  0x8e   :  { %1623 = vmatprep.mubr.msk.bf16.mxu0 %vm235_vm0, %v2259_v15  ;;  %2042 = vmatpush3.bf16.msra.mxu0 %v2622_v22  ;;  %v2284_v15 = vld [vmem:[#allocation5 + $0xa0] sm:$0xff]  }
  0x8f   :  { %2043 = vmatprep.subr.bf16.mxu0 %v2470_v17 }
  0x92   :  { %2045 = vmatpush3.bf16.msra.mxu0 %v2625_v24 }
  0x93   :  { %2046 = vmatprep.subr.bf16.mxu0 %v2470_v17 }
  0x95   :  { %283 = vmatmul.mubr.bf16.gmra.mrb[4].mxu0 %v2261_v16 }
  0x96   :  { %1847 = vmatprep.mubr.msk.f32.mxu0 %vm2471_vm1, %v2472_v18  ;;  %2048 = vmatpush3.bf16.msra.mxu0 %v2629_v27 }
  0x97   :  { %2049 = vmatprep.subr.bf16.mxu0 %v2470_v17 }
  0x9a   :  { %2051 = vmatpush3.bf16.msra.mxu0 %v2633_v30 }
  0x9b   :  { %2052 = vmatprep.subr.bf16.mxu0 %v2470_v17 }
  0x9e   :  { %2054 = vmatpush3.bf16.msra.mxu0 %v2637_v33 }
  0x9f   :  { %2055 = vmatprep.subr.bf16.mxu0 %v2470_v17 }
  0xa2   :  { %2057 = vmatpush3.bf16.msra.mxu0 %v2641_v36 }
  0xa3   :  { %2058 = vmatprep.subr.bf16.mxu0 %v2470_v17 }
  0xa6   :  { %2060 = vmatpush3.bf16.msra.mxu0 %v2645_v39 }
  0xa7   :  { %2061 = vmatprep.subr.bf16.mxu0 %v2470_v17 }
  0xaa   :  { %2063 = vmatpush3.bf16.msra.mxu0 %v2649_v42 }
  0xab   :  { %2070 = vmatprep.subr.bf16.mxu0 %v2470_v17 }
 0x160   :  { %v276_v43 = vpop.f32.mrb[0].mxu0 }
 0x161   :  { %v278_v44 = vpop.f32.mrb[1].mxu0 }
 0x162   :  { %v279_v45 = vpop.f32.mrb[2].mxu0 }
 0x163   :  { %v281_v46 = vpop.f32.mrb[3].mxu0  ;;  %v2035_v47 = vpack.c.bf16 %v279_v45, %v276_v43 }
 0x165   :  { %2036 = vmatpush3.bf16.msra.mxu1 %v2035_v47 }
 0x166   :  { %2037 = vmatprep.subr.bf16.mxu1 %v2470_v17 }
 0x168   :  { %v284_v48 = vpop.f32.mrb[4].mxu0 }
 0x169   :  { %v286_v49 = vpop.f32.mrb[5].mxu0 }
 0x16a   :  { %v287_v50 = vpop.f32.mrb[6].mxu0  ;;  %v2266_v49 = vld [vmem:[#allocation5 + $0x40] sm:$0xff]  }
 0x16b   :  { %v2038_v51 = vpack.c.bf16 %v287_v50, %v284_v48  ;;  %v289_v52 = vpop.f32.mrb[7].mxu0 }
 0x16c   :  { %v2267_v52 = vld [vmem:[#allocation5] sm:$0xff]  }
 0x16d   :  { %2039 = vmatpush3.bf16.msra.mxu1 %v2038_v51  ;;  %v2264_v51 = vld [vmem:[%s2807_s3 + $0x10] sm:$0xff]  }
 0x16e   :  { %2064 = vmatprep.subr.bf16.mxu1 %v2470_v17 }
 0x170   :  { %1813 = vmatmul.mubr.msk.f32.vlgmr.msra.gmra.mrb[0].mxu1 %vm291_vm2, %v2473_v53 }
 0x171   :  { %1858 = vmatprep.mubr.msk.f32.mxu1 %vm2471_vm1, %v2472_v18 }
 0x243   :  { %v361_v54 = vpop.f32.mrb[0].mxu1 }
 0x244   :  { %v1814_v55 = vpop.f32.mrb[1].mxu1  ;;  %1848 = vmatmul.mubr.f32.vlgmr.msra.gmra.mrb[8].mxu0 %v361_v54  ;;  %v2268_v54 = vld [vmem:[#allocation5 + $0x48] sm:$0xff]  }
 0x245   :  { %2072 = vmatpush3.bf16.msra.mxu0 %v2622_v22  ;;  %1893 = vmatprep.mubr.msk.f32.mxu0 %vm2471_vm1, %v2472_v18  ;;  %v2269_v55 = vld [vmem:[#allocation5 + $0x8] sm:$0xff]  }
 0x246   :  { %2073 = vmatprep.subr.bf16.mxu0 %v2470_v17 }
 0x249   :  { %2075 = vmatpush3.bf16.msra.mxu0 %v2625_v24 }
 0x24a   :  { %2076 = vmatprep.subr.bf16.mxu0 %v2470_v17 }
 0x24d   :  { %2078 = vmatpush3.bf16.msra.mxu0 %v2629_v27 }
 0x24e   :  { %2079 = vmatprep.subr.bf16.mxu0 %v2470_v17 }
 0x251   :  { %2081 = vmatpush3.bf16.msra.mxu0 %v2633_v30 }
 0x252   :  { %2082 = vmatprep.subr.bf16.mxu0 %v2470_v17 }
 0x255   :  { %2084 = vmatpush3.bf16.msra.mxu0 %v2637_v33 }
 0x256   :  { %2085 = vmatprep.subr.bf16.mxu0 %v2470_v17 }
 0x259   :  { %2087 = vmatpush3.bf16.msra.mxu0 %v2641_v36 }
 0x25a   :  { %2088 = vmatprep.subr.bf16.mxu0 %v2470_v17 }
 0x25d   :  { %2090 = vmatpush3.bf16.msra.mxu0 %v2645_v39 }
 0x25e   :  { %2091 = vmatprep.subr.bf16.mxu0 %v2470_v17 }
 0x261   :  { %2093 = vmatpush3.bf16.msra.mxu0 %v2649_v42 }
 0x262   :  { %1908 = vmatprep.subr.bf16.mxu0 %v2272_v11 }
 0x317   :  { %v431_v59 = vpop.f32.mrb[8].mxu0 }
 0x318   :  { %v438_v60 = vrot.slane %v431_v59, %v2680_v58  ;;  %v1849_v61 = vpop.f32.mrb[9].mxu0  ;;  %v2265_v59 = vld [vmem:[%s2807_s3 + $0x18] sm:$0xff]  }
 0x319   :  { %v2273_v61 = vld [vmem:[#allocation5 + $0x58] sm:$0xff]  }
 0x31a   :  { %v439_v62 = vsub.f32 %v276_v43, %v438_v60  ;;  %v440_v63 = vsub.f32 %v279_v45, %v438_v60  ;;  %v441_v0 = vsub.f32 %v284_v48, %v438_v60  ;;  %v442_v1 = vsub.f32 %v287_v50, %v438_v60  ;;  %v2263_v50 = vld [vmem:[%s2807_s3 + $0x8] sm:$0xff]   ;;  %v2271_v60 = vld [vmem:[#allocation5 + $0x10] sm:$0xff]  }
 0x31c   :  { %v443_v2 = vmul.f32 %v439_v62, %v439_v62  ;;  %v444_v3 = vmul.f32 %v440_v63, %v440_v63  ;;  %v445_v5 = vmul.f32 %v441_v0, %v441_v0  ;;  %v446_v6 = vmul.f32 %v442_v1, %v442_v1 }
 0x31e   :  { %v2065_v4 = vpack.c.bf16 %v444_v3, %v443_v2  ;;  %v2068_v7 = vpack.c.bf16 %v446_v6, %v445_v5  ;;  %v2280_v2 = vld [vmem:[#allocation5 + $0x28] sm:$0xff]   ;;  %v2282_v3 = vld [vmem:[#allocation5 + $0x70] sm:$0xff]   ;;  %v2285_v5 = vld [vmem:[#allocation5 + $0x78] sm:$0xff]  }
 0x31f   :  { %v2286_v6 = vld [vmem:[#allocation5 + $0x38] sm:$0xff]  }
 0x320   :  { %2066 = vmatpush3.bf16.msra.mxu1 %v2065_v4  ;;  %v2283_v4 = vld [vmem:[#allocation5 + $0x30] sm:$0xff]  }
 0x321   :  { %2067 = vmatprep.subr.bf16.mxu1 %v2470_v17 }
 0x324   :  { %2069 = vmatpush3.bf16.msra.mxu1 %v2068_v7  ;;  %v2287_v7 = vld [vmem:[#allocation5 + $0xa8] sm:$0xff]  }
 0x327   :  { %1859 = vmatmul.mubr.msk.f32.vlgmr.msra.gmra.mrb[2].mxu1 %vm291_vm2, %v2473_v53 }
 0x328   :  { %1900 = vmatprep.mubr.msk.bf16.mxu1 %vm291_vm2, %v2262_v10 }
 0x3fa   :  { %v513_v8 = vpop.f32.mrb[2].mxu1 }
 0x3fb   :  { %v1860_v9 = vpop.f32.mrb[3].mxu1  ;;  %1894 = vmatmul.mubr.f32.vlgmr.msra.gmra.mrb[10].mxu0 %v513_v8  ;;  %v2288_v8 = vld [vmem:[#allocation5 + $0xb0] sm:$0xff]  }
 0x3fc   :  { %1909 = vmatpush3.bf16.msra.mxu0 %v2272_v11  ;;  %v2289_v9 = vld [vmem:[#allocation5 + $0xb8] sm:$0xff]  }
 0x3fd   :  { %1910 = vmatprep.subr.bf16.mxu0 %v2275_v12 }
 0x400   :  { %1911 = vmatpush3.bf16.msra.mxu0 %v2275_v12 }
 0x401   :  { %1912 = vmatprep.subr.bf16.mxu0 %v2278_v13 }
 0x404   :  { %1913 = vmatpush3.bf16.msra.mxu0 %v2278_v13 }
 0x405   :  { %1914 = vmatprep.subr.bf16.mxu0 %v2281_v14 }
 0x408   :  { %1915 = vmatpush3.bf16.msra.mxu0 %v2281_v14 }
 0x409   :  { %1916 = vmatprep.subr.bf16.mxu0 %v2284_v15 }
 0x40c   :  { %1917 = vmatpush3.bf16.msra.mxu0 %v2284_v15 }
 0x40d   :  { %1918 = vmatprep.subr.bf16.mxu0 %v2287_v7 }
 0x410   :  { %1919 = vmatpush3.bf16.msra.mxu0 %v2287_v7 }
 0x411   :  { %1920 = vmatprep.subr.bf16.mxu0 %v2288_v8 }
 0x414   :  { %1921 = vmatpush3.bf16.msra.mxu0 %v2288_v8 }
 0x415   :  { %1922 = vmatprep.subr.bf16.mxu0 %v2289_v9 }
 0x418   :  { %1923 = vmatpush3.bf16.msra.mxu0 %v2289_v9 }
 0x419   :  { %2124 = vmatprep.subr.bf16.mxu0 %v2470_v17 }
 0x4ce   :  { %v583_v16 = vpop.f32.mrb[10].mxu0 }
 0x4cf   :  { %v587_v19 = vadd.f32 1e-05, %v583_v16  ;;  %v1895_v20 = vpop.f32.mrb[11].mxu0 }
 0x4d1   :  { %2290 = vrsqrt.f32 %v587_v19 }
 0x4db   :  { %v2291_v25 = vpop.eup %2290 }
 0x4dc   :  { %v589_v26 = vmul.f32 %v2291_v25, %v2690_v21 }
 0x4de   :  { %v593_v28 = vrot.slane %v589_v26, %v2680_v58 }
 0x4e0   :  { %v594_v31 = vmul.f32 %v593_v28, %v439_v62  ;;  %v595_v32 = vmul.f32 %v593_v28, %v440_v63  ;;  %v596_v34 = vmul.f32 %v593_v28, %v441_v0  ;;  %v597_v35 = vmul.f32 %v593_v28, %v442_v1  ;;  %v2274_v62 = vld [vmem:[#allocation5 + $0x18] sm:$0xff]   ;;  %v2276_v63 = vld [vmem:[#allocation5 + $0x60] sm:$0xff]   ;;  %v2279_v1 = vld [vmem:[#allocation5 + $0x68] sm:$0xff]  }
 0x4e1   :  { %v2277_v0 = vld [vmem:[#allocation5 + $0x20] sm:$0xff]  }
 0x4e2   :  { %v602_v37 = vadd.f32 %v601_v29, %v594_v31  ;;  %v603_v38 = vadd.f32 %v601_v29, %v595_v32  ;;  %v604_v40 = vadd.f32 %v601_v29, %v596_v34  ;;  %v605_v41 = vadd.f32 %v601_v29, %v597_v35 }
 0x4e4   :  { %v606_v43 = vmax.f32 %v602_v37, 0.0  ;;  %v607_v44 = vmax.f32 %v603_v38, 0.0  ;;  %v608_v45 = vmax.f32 %v604_v40, 0.0  ;;  %v609_v46 = vmax.f32 %v605_v41, 0.0 }
 0x4e6   :  { %v610_v47 = vpack.c.bf16 %v607_v44, %v606_v43  ;;  %v611_v48 = vpack.c.bf16 %v609_v46, %v608_v45 }
 0x4e8   :  { %1896 = vmatprep.subr.bf16.mxu1 %v610_v47 }
 0x4e9   :  { %1897 = vmatpush3.bf16.msra.mxu1 %v610_v47 }
 0x4ea   :  { %1898 = vmatprep.subr.bf16.mxu1 %v611_v48 }
 0x4ed   :  { %1899 = vmatpush3.bf16.msra.mxu1 %v611_v48 }
 0x4ee   :  { %1714 = vmatprep.subr.bf16.mxu1 %v2266_v49 }
 0x4f0   :  { %1901 = vmatmul.mubr.msk.bf16.vlgmr.msra.gmra.mrb[4].mxu1 %vm291_vm2, %v2263_v50 }
 0x4f1   :  { %1904 = vmatprep.mubr.msk.bf16.mxu1 %vm291_vm2, %v2264_v51  ;;  %1715 = vmatpush3.bf16.msra.mxu1 %v2267_v52 }
 0x4f2   :  { %1716 = vmatprep.subr.bf16.mxu1 %v2268_v54 }
 0x4f5   :  { %1717 = vmatpush3.bf16.msra.mxu1 %v2269_v55 }
 0x4f6   :  { %1718 = vmatprep.subr.bf16.mxu1 %v2270_v56 }
 0x4f8   :  { %1905 = vmatmul.mubr.msk.bf16.gmra.mrb[8].mxu1 %vm291_vm2, %v2265_v59 }
 0x4f9   :  { %945 = vmatprep.mubr.bf16.mxu1 %v610_v47  ;;  %1719 = vmatpush3.bf16.msra.mxu1 %v2271_v60 }
 0x4fa   :  { %1720 = vmatprep.subr.bf16.mxu1 %v2273_v61 }
 0x4fd   :  { %1721 = vmatpush3.bf16.msra.mxu1 %v2274_v62 }
 0x4fe   :  { %1722 = vmatprep.subr.bf16.mxu1 %v2276_v63 }
 0x501   :  { %1723 = vmatpush3.bf16.msra.mxu1 %v2277_v0 }
 0x502   :  { %1724 = vmatprep.subr.bf16.mxu1 %v2279_v1 }
 0x505   :  { %1725 = vmatpush3.bf16.msra.mxu1 %v2280_v2 }
 0x506   :  { %1726 = vmatprep.subr.bf16.mxu1 %v2282_v3 }
 0x509   :  { %1727 = vmatpush3.bf16.msra.mxu1 %v2283_v4 }
 0x50a   :  { %1728 = vmatprep.subr.bf16.mxu1 %v2285_v5 }
 0x50d   :  { %1729 = vmatpush3.bf16.msra.mxu1 %v2286_v6 }
 0x50e   :  { %2094 = vmatprep.subr.bf16.mxu1 %v2470_v17 }
 0x5c3   :  { %v1902_v10 = vpop.f32.mrb[4].mxu1 }
 0x5c4   :  { %v686_v11 = vpop.f32.mrb[5].mxu1 }
 0x5c5   :  { %v1903_v12 = vpop.f32.mrb[6].mxu1 }
 0x5c6   :  { %v718_v13 = vpack.c.bf16 %v1903_v12, %v1902_v10  ;;  %v689_v14 = vpop.f32.mrb[7].mxu1 }
 0x5c7   :  { %v717_v15 = vpack.c.bf16 %v689_v14, %v686_v11 }
 0x5c9   :  { %946 = vmatmul.mubr.bf16.vlgmr.msra.gmra.mrb[12].mxu1 %v717_v15 }
 0x5ca   :  { %953 = vmatprep.mubr.bf16.mxu1 %v611_v48 }
 0x5cb   :  { %v1906_v16 = vpop.f32.mrb[8].mxu1 }
 0x5cc   :  { %v702_v19 = vpop.f32.mrb[9].mxu1 }
 0x5cd   :  { %v1907_v20 = vpop.f32.mrb[10].mxu1 }
 0x5ce   :  { %v720_v23 = vpack.c.bf16 %v1907_v20, %v1906_v16  ;;  %v705_v25 = vpop.f32.mrb[11].mxu1 }
 0x5cf   :  { %v719_v26 = vpack.c.bf16 %v705_v25, %v702_v19 }
 0x5d1   :  { %954 = vmatmul.mubr.bf16.gmra.mrb[16].mxu1 %v718_v13  ;;  %1924 = vmatprep.mubr.bf16.mxu0 %v719_v26 }
 0x5d2   :  { %1925 = vmatmul.mubr.bf16.vlgmr.msra.gmra.mrb[12].mxu0 %v720_v23  ;;  %1936 = vmatprep.mubr.msk.f32.mxu1 %vm2471_vm1, %v2472_v18 }
 0x5d3   :  { %1982 = vmatprep.mubr.msk.f32.mxu0 %vm2471_vm1, %v2472_v18 }
 0x69c   :  { %v1730_v28 = vpop.f32.mrb[12].mxu1 }
 0x69d   :  { %v1731_v29 = vpop.f32.mrb[13].mxu1 }
 0x69e   :  { %v1732_v31 = vadd.f32 %v1731_v29, %v1730_v28  ;;  %v1733_v32 = vpop.f32.mrb[14].mxu1  ;;  %v1437_v28 = vld [vmem:[#allocation10 + $0x8] sm:$0xff]  ;;  %v1439_v29 = vld [vmem:[#allocation10 + $0x18] sm:$0xff] }
 0x69f   :  { %v1734_v34 = vpop.f32.mrb[15].mxu1 }
 0x6a0   :  { %v1735_v35 = vadd.f32 %v1734_v34, %v1733_v32  ;;  %v1436_v32 = vld [vmem:[#allocation10] sm:$0xff]  ;;  %v1438_v34 = vld [vmem:[#allocation10 + $0x10] sm:$0xff] }
 0x6a4   :  { %v1736_v37 = vpop.f32.mrb[16].mxu1 }
 0x6a5   :  { %v1737_v38 = vpop.f32.mrb[17].mxu1  ;;  %v1926_v40 = vpop.f32.mrb[12].mxu0 }
 0x6a6   :  { %v1738_v41 = vadd.f32 %v1737_v38, %v1736_v37  ;;  %v1739_v43 = vpop.f32.mrb[18].mxu1  ;;  %v996_v44 = vpop.f32.mrb[13].mxu0  ;;  %v1443_v37 = vld [vmem:[#allocation10 + $0x38] sm:$0xff]  ;;  %v1334_v38 = vld [vmem:[%s2810_s6 + $0x8] sm:$0xff] }
 0x6a7   :  { %v997_v45 = vadd.f32 %v1732_v31, %v996_v44  ;;  %v1740_v46 = vpop.f32.mrb[19].mxu1  ;;  %v1927_v47 = vpop.f32.mrb[14].mxu0  ;;  %v2162_v31 = vpack.c.bf16 %v1439_v29, %v1437_v28  ;;  %v1440_v44 = vld [vmem:[#allocation10 + $0x20] sm:$0xff]  ;;  %v1479_v28 = vld [vmem:[#allocation10 + $0x158] sm:$0xff] }
 0x6a8   :  { %v1005_v48 = vadd.f32 %v1926_v40, %v1738_v41  ;;  %v1741_v49 = vadd.f32 %v1740_v46, %v1739_v43  ;;  %v999_v50 = vpop.f32.mrb[15].mxu0  ;;  %v2164_v40 = vpack.c.bf16 %v1438_v34, %v1436_v32  ;;  %v1335_v41 = vld [vmem:[%s2810_s6 + $0x10] sm:$0xff] }
 0x6a9   :  { %v1000_v51 = vadd.f32 %v1735_v35, %v999_v50  ;;  %v1441_v35 = vld [vmem:[#allocation10 + $0x28] sm:$0xff]  ;;  %v1478_v32 = vld [vmem:[#allocation10 + $0x150] sm:$0xff] }
 0x6aa   :  { %v1008_v52 = vadd.f32 %v1927_v47, %v1741_v49  ;;  %v2166_v43 = vpack.c.bf16 %v1443_v37, %v1441_v35  ;;  %v1445_v46 = vld [vmem:[#allocation10 + $0x48] sm:$0xff]  ;;  %v1447_v47 = vld [vmem:[#allocation10 + $0x58] sm:$0xff] }
 0x6ab   :  { %v2095_v54 = vpack.c.bf16 %v1000_v51, %v997_v45  ;;  %v2170_v50 = vpack.c.bf16 %v1447_v47, %v1445_v46  ;;  %v1481_v34 = vld [vmem:[#allocation10 + $0x168] sm:$0xff]  ;;  %v1483_v35 = vld [vmem:[#allocation10 + $0x178] sm:$0xff]  ;;  %v1484_v47 = vld [vmem:[#allocation10 + $0x180] sm:$0xff] }
 0x6ac   :  { %v2098_v55 = vpack.c.bf16 %v1008_v52, %v1005_v48 }
 0x6ad   :  { %2096 = vmatpush3.bf16.msra.mxu1 %v2095_v54  ;;  %v1449_v54 = vld [vmem:[#allocation10 + $0x68] sm:$0xff] }
 0x6ae   :  { %2097 = vmatprep.subr.bf16.mxu1 %v2470_v17 }
 0x6b1   :  { %2099 = vmatpush3.bf16.msra.mxu1 %v2098_v55  ;;  %v1451_v55 = vld [vmem:[#allocation10 + $0x78] sm:$0xff] }
 0x6b2   :  { %2100 = vmatprep.subr.bf16.mxu1 %v2470_v17 }
 0x6b4   :  { %1937 = vmatmul.mubr.msk.f32.vlgmr.msra.gmra.mrb[20].mxu1 %vm291_vm2, %v2473_v53 }
 0x6b5   :  { %2102 = vmatpush3.bf16.msra.mxu1 %v2622_v22  ;;  %1971 = vmatprep.mubr.msk.f32.mxu1 %vm2471_vm1, %v2472_v18 }
 0x6b6   :  { %2103 = vmatprep.subr.bf16.mxu1 %v2470_v17 }
 0x6b9   :  { %2105 = vmatpush3.bf16.msra.mxu1 %v2625_v24 }
 0x6ba   :  { %2106 = vmatprep.subr.bf16.mxu1 %v2470_v17 }
 0x6bd   :  { %2108 = vmatpush3.bf16.msra.mxu1 %v2629_v27 }
 0x6be   :  { %2109 = vmatprep.subr.bf16.mxu1 %v2470_v17 }
 0x6c1   :  { %2111 = vmatpush3.bf16.msra.mxu1 %v2633_v30 }
 0x6c2   :  { %2112 = vmatprep.subr.bf16.mxu1 %v2470_v17 }
 0x6c5   :  { %2114 = vmatpush3.bf16.msra.mxu1 %v2637_v33 }
 0x6c6   :  { %2115 = vmatprep.subr.bf16.mxu1 %v2470_v17 }
 0x6c9   :  { %2117 = vmatpush3.bf16.msra.mxu1 %v2641_v36 }
 0x6ca   :  { %2118 = vmatprep.subr.bf16.mxu1 %v2470_v17 }
 0x6cd   :  { %2120 = vmatpush3.bf16.msra.mxu1 %v2645_v39 }
 0x6ce   :  { %2121 = vmatprep.subr.bf16.mxu1 %v2470_v17 }
 0x6d1   :  { %2123 = vmatpush3.bf16.msra.mxu1 %v2649_v42 }
 0x787   :  { %v1077_v56 = vpop.f32.mrb[20].mxu1 }
 0x788   :  { %1972 = vmatmul.mubr.f32.vlgmr.msra.gmra.mrb[22].mxu1 %v1077_v56  ;;  %v1938_v59 = vpop.f32.mrb[21].mxu1 }
 0x789   :  { %v2174_v59 = vpack.c.bf16 %v1451_v55, %v1449_v54  ;;  %v1488_v54 = vld [vmem:[#allocation10 + $0x1a0] sm:$0xff]  ;;  %v1490_v55 = vld [vmem:[#allocation10 + $0x1b0] sm:$0xff] }
 0x85b   :  { %v1147_v60 = vpop.f32.mrb[22].mxu1 }
 0x85c   :  { %v1154_v61 = vrot.slane %v1147_v60, %v2680_v58  ;;  %v1973_v62 = vpop.f32.mrb[23].mxu1  ;;  %v1448_v60 = vld [vmem:[#allocation10 + $0x60] sm:$0xff] }
 0x85d   :  { %v1453_v62 = vld [vmem:[#allocation10 + $0x88] sm:$0xff] }
 0x85e   :  { %v1155_v63 = vsub.f32 %v997_v45, %v1154_v61  ;;  %v1156_v0 = vsub.f32 %v1000_v51, %v1154_v61  ;;  %v1157_v1 = vsub.f32 %v1005_v48, %v1154_v61  ;;  %v1158_v2 = vsub.f32 %v1008_v52, %v1154_v61  ;;  %v1442_v45 = vld [vmem:[#allocation10 + $0x30] sm:$0xff]  ;;  %v1444_v51 = vld [vmem:[#allocation10 + $0x40] sm:$0xff] }
 0x85f   :  { %v1336_v48 = vld [vmem:[%s2810_s6 + $0x18] sm:$0xff]  ;;  %v2168_v49 = vpack.c.bf16 %v1442_v45, %v1440_v44 }
 0x860   :  { %v1159_v3 = vmul.f32 %v1155_v63, %v1155_v63  ;;  %v1160_v4 = vmul.f32 %v1156_v0, %v1156_v0  ;;  %v1161_v6 = vmul.f32 %v1157_v1, %v1157_v1  ;;  %v1162_v7 = vmul.f32 %v1158_v2, %v1158_v2  ;;  %v1446_v52 = vld [vmem:[#allocation10 + $0x50] sm:$0xff]  ;;  %v1487_v44 = vld [vmem:[#allocation10 + $0x198] sm:$0xff] }
 0x861   :  { %v2172_v56 = vpack.c.bf16 %v1446_v52, %v1444_v51  ;;  %v1450_v61 = vld [vmem:[#allocation10 + $0x70] sm:$0xff] }
 0x862   :  { %v2125_v5 = vpack.c.bf16 %v1160_v4, %v1159_v3  ;;  %v2128_v8 = vpack.c.bf16 %v1162_v7, %v1161_v6  ;;  %v1454_v3 = vld [vmem:[#allocation10 + $0x90] sm:$0xff]  ;;  %v1457_v4 = vld [vmem:[#allocation10 + $0xa8] sm:$0xff] }
 0x864   :  { %2126 = vmatpush3.bf16.msra.mxu0 %v2125_v5  ;;  %v1459_v5 = vld [vmem:[#allocation10 + $0xb8] sm:$0xff] }
 0x865   :  { %2127 = vmatprep.subr.bf16.mxu0 %v2470_v17  ;;  %v2182_v7 = vpack.c.bf16 %v1459_v5, %v1457_v4  ;;  %v1496_v4 = vld [vmem:[#allocation10 + $0x1e0] sm:$0xff]  ;;  %v1498_v5 = vld [vmem:[#allocation10 + $0x1f0] sm:$0xff] }
 0x868   :  { %2129 = vmatpush3.bf16.msra.mxu0 %v2128_v8  ;;  %v1456_v8 = vld [vmem:[#allocation10 + $0xa0] sm:$0xff] }
 0x869   :  { %2130 = vmatprep.subr.bf16.mxu0 %v2470_v17 }
 0x86b   :  { %1983 = vmatmul.mubr.msk.f32.vlgmr.msra.gmra.mrb[16].mxu0 %vm291_vm2, %v2473_v53 }
 0x86c   :  { %2132 = vmatpush3.bf16.msra.mxu0 %v2622_v22  ;;  %2017 = vmatprep.mubr.msk.f32.mxu0 %vm2471_vm1, %v2472_v18 }
 0x86d   :  { %2133 = vmatprep.subr.bf16.mxu0 %v2470_v17 }
 0x870   :  { %2135 = vmatpush3.bf16.msra.mxu0 %v2625_v24  ;;  %v1333_v24 = vld [vmem:[%s2810_s6] sm:$0xff]  ;;  %s2474_s6 = smov [#allocation11]  }
 0x871   :  { %2136 = vmatprep.subr.bf16.mxu0 %v2470_v17  ;;  %2028 = vmatprep.mubr.msk.f32.mxu1 %vm291_vm2, %v1333_v24  ;;  %v1463_v24 = vld [vmem:[#allocation10 + $0xd8] sm:$0xff]  ;;  %s1578_s29 = sshll.u32 %s2474_s6, 4  ;;  %s1579_s29 = int_to_ptr.vmem [resolvable:$true] %s1578_s29 }
 0x872   :  { %s2404_s30 = scalar_lea.vmem %s1579_s29, 512  ;;  %p2409_p13 = scmp.lt.s32.totalorder %s1579_s29, %s1579_s29 }
 0x873   :  { %p2405_p12 = scmp.ne.s32.totalorder %s1579_s29, %s2404_s30  ;;  %p2410_p0 = scmp.lt.s32.totalorder %s2404_s30, %s2404_s30 }
 0x874   :  { %2138 = vmatpush3.bf16.msra.mxu0 %v2629_v27 }
 0x875   :  { %2139 = vmatprep.subr.bf16.mxu0 %v2470_v17  ;;  %p2411_p1 = por %p2410_p0, %p2409_p13 }
 0x877   :  { %p2412_p2 = pnand %p2411_p1, %p2405_p12 }
 0x878   :  { %2141 = vmatpush3.bf16.msra.mxu0 %v2633_v30 }
 0x879   :  { %2142 = vmatprep.subr.bf16.mxu0 %v2470_v17 }
 0x87c   :  { %2144 = vmatpush3.bf16.msra.mxu0 %v2637_v33 }
 0x87d   :  { %2145 = vmatprep.subr.bf16.mxu0 %v2470_v17 }
 0x880   :  { %2147 = vmatpush3.bf16.msra.mxu0 %v2641_v36 }
 0x881   :  { %2148 = vmatprep.subr.bf16.mxu0 %v2470_v17 }
 0x884   :  { %2150 = vmatpush3.bf16.msra.mxu0 %v2645_v39  ;;  %v1311_v39 = vsub.s32 2, %v2677_v57 }
 0x885   :  { %2151 = vmatprep.subr.bf16.mxu0 %v2470_v17  ;;  %v1319_v17 = vsub.s32 3, %v2677_v57 }
 0x887   :  { %v1320_v9 = vrot.slane %v2690_v21, %v1319_v17 }
 0x888   :  { %2153 = vmatpush3.bf16.msra.mxu0 %v2649_v42 }
 0x93e   :  { %v1229_v18 = vpop.f32.mrb[16].mxu0 }
 0x93f   :  { %2018 = vmatmul.mubr.f32.vlgmr.msra.gmra.mrb[18].mxu0 %v1229_v18  ;;  %v1984_v22 = vpop.f32.mrb[17].mxu0  ;;  %v1458_v18 = vld [vmem:[#allocation10 + $0xb0] sm:$0xff] }
 0x940   :  { %v1461_v22 = vld [vmem:[#allocation10 + $0xc8] sm:$0xff] }
 0xa12   :  { %v1299_v27 = vpop.f32.mrb[18].mxu0 }
 0xa13   :  { %v1303_v30 = vadd.f32 1e-05, %v1299_v27  ;;  %v2019_v33 = vpop.f32.mrb[19].mxu0  ;;  %v2184_v27 = vpack.c.bf16 %v1458_v18, %v1456_v8 }
 0xa14   :  { %v1460_v33 = vld [vmem:[#allocation10 + $0xc0] sm:$0xff] }
 0xa15   :  { %2292 = vrsqrt.f32 %v1303_v30  ;;  %v2186_v30 = vpack.c.bf16 %v1463_v24, %v1461_v22 }
 0xa1f   :  { %v2293_v36 = vpop.eup %2292 }
 0xa20   :  { %v1306_v53 = vrot.slane %v2293_v36, 6  ;;  %v1462_v36 = vld [vmem:[#allocation10 + $0xd0] sm:$0xff] }
 0xa21   :  { %v2188_v17 = vpack.c.bf16 %v1462_v36, %v1460_v33 }
 0xa22   :  { %v1308_v42 = vmul.f32 %v1306_v53, %v2690_v21  ;;  %v1465_v53 = vld [vmem:[#allocation10 + $0xe8] sm:$0xff] }
 0xa24   :  { %v1312_v58 = vrot.slane %v1308_v42, %v1311_v39  ;;  %v1467_v39 = vld [vmem:[#allocation10 + $0xf8] sm:$0xff] }
 0xa25   :  { %v2190_v42 = vpack.c.bf16 %v1467_v39, %v1465_v53 }
 0xa26   :  { %v1313_v10 = vmul.f32 %v1312_v58, %v1155_v63  ;;  %v1314_v11 = vmul.f32 %v1312_v58, %v1156_v0  ;;  %v1315_v12 = vmul.f32 %v1312_v58, %v1157_v1  ;;  %v1316_v13 = vmul.f32 %v1312_v58, %v1158_v2  ;;  %v1455_v63 = vld [vmem:[#allocation10 + $0x98] sm:$0xff]  ;;  %v1452_v2 = vld [vmem:[#allocation10 + $0x80] sm:$0xff] }
 0xa27   :  { %v2176_v0 = vpack.c.bf16 %v1450_v61, %v1448_v60  ;;  %v2178_v1 = vpack.c.bf16 %v1455_v63, %v1453_v62  ;;  %v2180_v6 = vpack.c.bf16 %v1454_v3, %v1452_v2  ;;  %v1464_v58 = vld [vmem:[#allocation10 + $0xe0] sm:$0xff]  ;;  %v2216_v60 = vpack.c.bf16 %v1490_v55, %v1488_v54  ;;  %v1494_v63 = vld [vmem:[#allocation10 + $0x1d0] sm:$0xff]  ;;  %v1499_v2 = vld [vmem:[#allocation10 + $0x1f8] sm:$0xff] }
 0xa28   :  { %v1321_v14 = vadd.f32 %v1320_v9, %v1313_v10  ;;  %v1322_v15 = vadd.f32 %v1320_v9, %v1314_v11  ;;  %v1323_v16 = vadd.f32 %v1320_v9, %v1315_v12  ;;  %v1324_v19 = vadd.f32 %v1320_v9, %v1316_v13  ;;  %v1466_v9 = vld [vmem:[#allocation10 + $0xf0] sm:$0xff]  ;;  %v1469_v10 = vld [vmem:[#allocation10 + $0x108] sm:$0xff]  ;;  %v1471_v11 = vld [vmem:[#allocation10 + $0x118] sm:$0xff] }
 0xa29   :  { %v2192_v12 = vpack.c.bf16 %v1466_v9, %v1464_v58  ;;  %v2194_v13 = vpack.c.bf16 %v1471_v11, %v1469_v10  ;;  %v1492_v62 = vld [vmem:[#allocation10 + $0x1c0] sm:$0xff] }
 0xa2a   :  { %v1325_v20 = vmax.f32 %v1321_v14, 0.0  ;;  %v1326_v23 = vmax.f32 %v1322_v15, 0.0  ;;  %v1327_v25 = vmax.f32 %v1323_v16, 0.0  ;;  %v1328_v26 = vmax.f32 %v1324_v19, 0.0  ;;  %v1468_v14 = vld [vmem:[#allocation10 + $0x100] sm:$0xff]  ;;  %v1470_v15 = vld [vmem:[#allocation10 + $0x110] sm:$0xff] }
 0xa2b   :  { %v1473_v16 = vld [vmem:[#allocation10 + $0x128] sm:$0xff]  ;;  %v1475_v19 = vld [vmem:[#allocation10 + $0x138] sm:$0xff] }
 0xa2c   :  { %1329 = vst [vmem:[#allocation11] sm:$0xff] %v1325_v20  ;;  %1330 = vst [vmem:[#allocation11 + $0x8] sm:$0xff] %v1326_v23  ;;  %v2154_v57 = vpack.c.bf16 %v1326_v23, %v1325_v20  ;;  %v2158_v21 = vpack.c.bf16 %v1328_v26, %v1327_v25  ;;  %v2196_v20 = vpack.c.bf16 %v1470_v15, %v1468_v14 }
 0xa2d   :  { %1331 = vst [vmem:[#allocation11 + $0x10] sm:$0xff] %v1327_v25  ;;  %1332 = vst [vmem:[#allocation11 + $0x18] sm:$0xff] %v1328_v26  ;;  %v2198_v23 = vpack.c.bf16 %v1475_v19, %v1473_v16  ;;  %v1472_v25 = vld [vmem:[#allocation10 + $0x120] sm:$0xff]  ;;  %v1474_v26 = vld [vmem:[#allocation10 + $0x130] sm:$0xff] }
 0xa2e   :  { %2155 = vmatprep.subr.bf16.mxu1 %v2154_v57  ;;  %v2200_v29 = vpack.c.bf16 %v1474_v26, %v1472_v25 }
 0xa2f   :  { %2157 = vmatpush3.bf16.msra.mxu1 %v2154_v57  ;;  %v1477_v57 = vld [vmem:[#allocation10 + $0x148] sm:$0xff] }
 0xa30   :  { %2159 = vmatprep.subr.bf16.mxu1 %v2158_v21 }
 0xa33   :  { %2161 = vmatpush3.bf16.msra.mxu1 %v2158_v21  ;;  %v2202_v21 = vpack.c.bf16 %v1479_v28, %v1477_v57 }
 0xa34   :  { %2163 = vmatprep.subr.bf16.mxu1 %v2162_v31  ;;  %v1476_v31 = vld [vmem:[#allocation10 + $0x140] sm:$0xff] }
 0xa35   :  { %v2204_v37 = vpack.c.bf16 %v1478_v32, %v1476_v31 }
 0xa36   :  { %2029 = vmatmul.mubr.msk.f32.vlgmr.msra.gmra.mrb[24].mxu1 %vm291_vm2, %v1334_v38  ;;  %v2206_v38 = vpack.c.bf16 %v1483_v35, %v1481_v34 }
 0xa37   :  { %2031 = vmatprep.mubr.msk.f32.mxu1 %vm291_vm2, %v1335_v41  ;;  %2165 = vmatpush1.bf16.msra.mxu1 %v2164_v40  ;;  %v1480_v40 = vld [vmem:[#allocation10 + $0x160] sm:$0xff]  ;;  %v1482_v41 = vld [vmem:[#allocation10 + $0x170] sm:$0xff] }
 0xa38   :  { %2167 = vmatprep.subr.bf16.mxu1 %v2166_v43  ;;  %v1485_v43 = vld [vmem:[#allocation10 + $0x188] sm:$0xff]  ;;  %v2208_v45 = vpack.c.bf16 %v1482_v41, %v1480_v40 }
 0xa39   :  { %v2210_v46 = vpack.c.bf16 %v1487_v44, %v1485_v43 }
 0xa3a   :  { %2032 = vmatmul.mubr.msk.f32.gmra.mrb[26].mxu1 %vm291_vm2, %v1336_v48  ;;  %v1486_v48 = vld [vmem:[#allocation10 + $0x190] sm:$0xff] }
 0xa3b   :  { %2169 = vmatpush1.bf16.msra.mxu1 %v2168_v49  ;;  %v1489_v49 = vld [vmem:[#allocation10 + $0x1a8] sm:$0xff]  ;;  %v2212_v51 = vpack.c.bf16 %v1486_v48, %v1484_v47 }
 0xa3c   :  { %2171 = vmatprep.subr.bf16.mxu1 %v2170_v50  ;;  %v1491_v50 = vld [vmem:[#allocation10 + $0x1b8] sm:$0xff] }
 0xa3d   :  { %v2214_v52 = vpack.c.bf16 %v1491_v50, %v1489_v49 }
 0xa3f   :  { %2173 = vmatpush1.bf16.msra.mxu1 %v2172_v56  ;;  %v1493_v56 = vld [vmem:[#allocation10 + $0x1c8] sm:$0xff] }
 0xa40   :  { %2175 = vmatprep.subr.bf16.mxu1 %v2174_v59  ;;  %v1495_v59 = vld [vmem:[#allocation10 + $0x1d8] sm:$0xff] }
 0xa41   :  { %v2218_v61 = vpack.c.bf16 %v1495_v59, %v1493_v56 }
 0xa43   :  { %2177 = vmatpush1.bf16.msra.mxu1 %v2176_v0  ;;  %v2220_v0 = vpack.c.bf16 %v1494_v63, %v1492_v62 }
 0xa44   :  { %2179 = vmatprep.subr.bf16.mxu1 %v2178_v1  ;;  %v1497_v1 = vld [vmem:[#allocation10 + $0x1e8] sm:$0xff] }
 0xa45   :  { %v2222_v3 = vpack.c.bf16 %v1499_v2, %v1497_v1 }
 0xa47   :  { %2181 = vmatpush1.bf16.msra.mxu1 %v2180_v6  ;;  %v2224_v6 = vpack.c.bf16 %v1498_v5, %v1496_v4 }
 0xa48   :  { %2183 = vmatprep.subr.bf16.mxu1 %v2182_v7 }
 0xa4b   :  { %2185 = vmatpush1.bf16.msra.mxu1 %v2184_v27 }
 0xa4c   :  { %2187 = vmatprep.subr.bf16.mxu1 %v2186_v30 }
 0xa4f   :  { %2189 = vmatpush1.bf16.msra.mxu1 %v2188_v17 }
 0xa50   :  { %2191 = vmatprep.subr.bf16.mxu1 %v2190_v42 }
 0xa53   :  { %2193 = vmatpush1.bf16.msra.mxu1 %v2192_v12 }
 0xa54   :  { %2195 = vmatprep.subr.bf16.mxu1 %v2194_v13 }
 0xa57   :  { %2197 = vmatpush1.bf16.msra.mxu1 %v2196_v20 }
 0xa58   :  { %2199 = vmatprep.subr.bf16.mxu1 %v2198_v23 }
 0xa5b   :  { %2201 = vmatpush1.bf16.msra.mxu1 %v2200_v29 }
 0xa5c   :  { %2203 = vmatprep.subr.bf16.mxu1 %v2202_v21 }
 0xa5f   :  { %2205 = vmatpush1.bf16.msra.mxu1 %v2204_v37 }
 0xa60   :  { %2207 = vmatprep.subr.bf16.mxu1 %v2206_v38 }
 0xa63   :  { %2209 = vmatpush1.bf16.msra.mxu1 %v2208_v45 }
 0xa64   :  { %2211 = vmatprep.subr.bf16.mxu1 %v2210_v46 }
 0xa67   :  { %2213 = vmatpush1.bf16.msra.mxu1 %v2212_v51 }
 0xa68   :  { %2215 = vmatprep.subr.bf16.mxu1 %v2214_v52 }
 0xa6b   :  { %2217 = vmatpush1.bf16.msra.mxu1 %v2216_v60 }
 0xa6c   :  { %2219 = vmatprep.subr.bf16.mxu1 %v2218_v61 }
 0xa6f   :  { %2221 = vmatpush1.bf16.msra.mxu1 %v2220_v0 }
 0xa70   :  { %2223 = vmatprep.subr.bf16.mxu1 %v2222_v3 }
 0xa73   :  { %2225 = vmatpush1.bf16.msra.mxu1 %v2224_v6 }
 0xb09   :  { %v2030_v7 = vpop.f32.mrb[24].mxu1 }
 0xb0a   :  { %v1415_v8 = vpop.f32.mrb[25].mxu1 }
 0xb0b   :  { %v1434_v18 = vmax.f32 %v1415_v8, %v2030_v7 }
 0xb0d   :  { %v2033_v22 = vpop.f32.mrb[26].mxu1 }
 0xb0e   :  { %v1425_v24 = vpop.f32.mrb[27].mxu1 }
 0xb0f   :  { %v1435_v27 = vmax.f32 %v1425_v24, %v2033_v22 }
 0xb11   :  { %1564 = vmatprep.mubr.f32.mxu1 %v1435_v27 }
 0xb12   :  { %1565 = vmatmul.mubr.f32.vlgmr.msra.gmra.mrb[28].mxu1 %v1434_v18 }
 0xb13   :  { %2415 = shalt.err (!%p2412_p2)
}
 0xb14   :  { %s2416_s13 = scalar_lea.hbm %s2812_s8, 512 }
 0xb15   :  { %p2417_p3 = scmp.ne.s32.totalorder %s2812_s8, %s2416_s13  ;;  %p2420_p4 = scmp.lt.u32.totalorder %s2416_s13, %s2812_s8 }
 0xb17   :  { %p2422_p5 = pnand %p2420_p4, %p2417_p3 }
 0xb19   :  { %2425 = shalt.err (!%p2422_p5)
}
 0xb1a   :  { %1584 = dma.vmem_to_hbm [thread:$0]  %s1579_s29, 512, %s2812_s8, [#allocation4], %s2462_s2, %s2462_s2, %s2463_s10  }
 0xb1b   :  { %s2475_s1 = smov [#allocation12]  }
 0xb1c   :  { %s1591_s21 = sshll.u32 %s2475_s1, 4  ;;  %s1592_s21 = int_to_ptr.vmem [resolvable:$true] %s1591_s21 }
 0xb1d   :  { %s2426_s22 = scalar_lea.vmem %s1592_s21, 128  ;;  %p2431_p7 = scmp.lt.s32.totalorder %s1592_s21, %s1592_s21 }
 0xb1e   :  { %p2427_p6 = scmp.ne.s32.totalorder %s1592_s21, %s2426_s22  ;;  %p2432_p8 = scmp.lt.s32.totalorder %s2426_s22, %s2426_s22 }
 0xb20   :  { %p2433_p9 = por %p2432_p8, %p2431_p7 }
 0xb22   :  { %p2434_p10 = pnand %p2433_p9, %p2427_p6 }
 0xbe5   :  { %v1566_v30 = vpop.f32.mrb[28].mxu1 }
 0xbe6   :  { %v1568_v33 = vpop.f32.mrb[29].mxu1 }
 0xbe7   :  { %v1571_v36 = vmax.f32 %v1566_v30, %v1568_v33 }
 0xbe9   :  { %1572 = vst [vmem:[#allocation12] sm:$0xff] %v1571_v36 }
 0xbea   :  { %2437 = shalt.err (!%p2434_p10)
}
 0xbeb   :  { %s2438_s24 = scalar_lea.hbm %s2813_s9, 128 }
 0xbec   :  { %p2439_p11 = scmp.ne.s32.totalorder %s2813_s9, %s2438_s24  ;;  %p2442_p12 = scmp.lt.u32.totalorder %s2438_s24, %s2813_s9 }
 0xbee   :  { %p2444_p13 = pnand %p2442_p12, %p2439_p11 }
 0xbf0   :  { %2447 = shalt.err (!%p2444_p13)
}
 0xbf1   :  { %1594 = dma.vmem_to_hbm [thread:$0]  %s1592_s21, 128, %s2813_s9, [#allocation13]  }
 0xbf2   :  { %2454 = dma.done.wait [#allocation4], 512  }
 0xbf3   :  { %2455 = vsyncadd [#allocation4], 4294966784 }
 0xbf4   :  { %2456 = dma.done.wait [#allocation13], 128  }
 0xbf5   :  { %2457 = vsyncadd [#allocation13], 4294967168 }
 0xbf6   :  { %1601 = vsyncpa [#allocation3], 1 }
 0xbf7   :  { %1602 = vsyncpa [#allocation6], 1 }
 0xbf8   :  { %1603 = vsyncpa [#allocation9], 1 }
 0xbf9   :  { %1604 = vsyncpa [#allocation4], 1 }
 0xbfa   :  { %1605 = vsyncpa [#allocation13], 1 }

</bundles_post_ra>
